<compile_context>
chip_gen: v7x
topology: tpu7x:2x2x1
jax: 0.10.0
libtpu: 0.0.40
codegen_flags: <defaults>
</compile_context>

<pallas_src>
import jax
import jax.numpy as jnp
from jax.experimental import pallas as pl
from jax.experimental.pallas import tpu as pltpu


NEG_SLOPE = 0.01  # PyTorch nn.LeakyReLU default negative_slope


def _round_up(x, m):
    return ((x + m - 1) // m) * m


def _encoder_kernel(state_ref, params_ref, o1_ref, o2_ref, o3_ref, o4_ref):
    # state_ref : (TN, 4)  f32 -- the 4 used state features per row
    # params_ref: (8, E)   f32 -- rows 0..3 = W_i[:, 0], rows 4..7 = b_i
    # oX_ref    : (TN, E)  f32 -- branch X output (lane-dense, unmasked store)
    x = state_ref[...]
    p = params_ref[...]
    out_refs = (o1_ref, o2_ref, o3_ref, o4_ref)
    for i, o_ref in enumerate(out_refs):
        xi = x[:, i:i + 1]                          # (TN, 1)
        y = xi * p[i:i + 1, :] + p[4 + i:5 + i, :]  # broadcast -> (TN, E), exact f32
        o_ref[...] = jnp.where(y >= 0, y, NEG_SLOPE * y)  # LeakyReLU


def encoder_network_forward(state, weights, biases, *, row_tile=1024):
    """
    state  : (B, S, F) float, F >= 4 (only the first 4 features are used)
    weights: (4, E) float32   (row i == fc{i+1}.weight[:, 0])
    biases : (4, E) float32   (row i == fc{i+1}.bias)
    returns: tuple of 4 arrays, each (B, S, E) float32
    """
    B, S, F = state.shape
    assert F >= 4, "EncoderNetwork uses the first 4 state features"
    E = weights.shape[1]
    N = B * S

    # Only DMA the 4 used feature columns (tiny vs the 4*E output columns).
    state_flat = state.reshape(N, F)[:, :4].astype(jnp.float32)

    # Row tile: multiple of 8 (f32 sublane), capped so double-buffering of the
    # four (TN, E) f32 output tiles stays well inside every chip's VMEM.
    TN = min(_round_up(row_tile, 8), _round_up(N, 8))
    N_pad = _round_up(N, TN)
    if N_pad != N:
        state_flat = jnp.pad(state_flat, ((0, N_pad - N), (0, 0)))

    # Pack params into a single VMEM-resident (8, E) operand.
    params = jnp.concatenate(
        [weights.astype(jnp.float32), biases.astype(jnp.float32)], axis=0
    )

    grid = (pl.cdiv(N_pad, TN),)
    out_bytes = 4 * N_pad * E * 4
    in_bytes = N_pad * 4 * 4 + 8 * E * 4

    out_shape = tuple(
        jax.ShapeDtypeStruct((N_pad, E), jnp.float32) for _ in range(4)
    )
    out_specs = [pl.BlockSpec((TN, E), lambda i: (i, 0)) for _ in range(4)]

    outs = pl.pallas_call(
        _encoder_kernel,
        out_shape=out_shape,
        grid=grid,
        in_specs=[
            pl.BlockSpec((TN, 4), lambda i: (i, 0)),
            pl.BlockSpec((8, E), lambda i: (0, 0)),
        ],
        out_specs=out_specs,
        compiler_params=pltpu.CompilerParams(
            dimension_semantics=("parallel",),
        ),
        cost_estimate=pl.CostEstimate(
            flops=2 * N_pad * 4 * E,
            transcendentals=0,
            bytes_accessed=in_bytes + out_bytes,
        ),
    )(state_flat, params)

    results = []
    for o in outs:
        if N_pad != N:
            o = o[:N]                    # drop row padding (rare path)
        results.append(o.reshape(B, S, E))  # row-major reshape: free
    return tuple(results)


def init_params(key, embed_dim):
    """Deterministic init mimicking nn.Linear(1, E): U(-1, 1) since fan_in = 1."""
    kw, kb = jax.random.split(key)
    weights = jax.random.uniform(kw, (4, embed_dim), jnp.float32, -1.0, 1.0)
    biases = jax.random.uniform(kb, (4, embed_dim), jnp.float32, -1.0, 1.0)
    return weights, biases


def reference_forward(state, weights, biases):
    """Pure-JAX reference reproducing the PyTorch forward exactly."""
    B, S, F = state.shape
    x = state.reshape(B * S, F, 1).astype(jnp.float32)
    outs = []
    for i in range(4):
        xi = x[:, i:i + 1, :]                                          # (N, 1, 1)
        y = xi * weights[i][None, None, :] + biases[i][None, None, :]  # (N, 1, E)
        y = jnp.where(y >= 0, y, NEG_SLOPE * y)
        outs.append(y.reshape(B, S, -1))
    return tuple(outs)


if __name__ == "__main__":
    key = jax.random.PRNGKey(0)
    k_state, k_params = jax.random.split(key)

    # batch=2, seq=8, 6 state features (only first 4 used), embed_dim=128
    B, S, F, E = 2, 8, 6, 128
    state = jax.random.normal(k_state, (B, S, F), dtype=jnp.float32)
    weights, biases = init_params(k_params, E)

    outs = encoder_network_forward(state, weights, biases)
    outs = jax.block_until_ready(outs)

    refs = reference_forward(state, weights, biases)
    for o, r in zip(outs, refs):
        assert o.shape == (B, S, E), o.shape
        assert jnp.allclose(o, r, atol=1e-5, rtol=1e-5)

    print("KERNEL_OK")
</pallas_src>

<mosaic_0001>
module attributes {stable_mosaic.version = 11 : i64} {
  func.func @_encoder_kernel(%arg0: i32, %arg1: memref<16x4xf32, #tpu.memory_space<vmem>>, %arg2: memref<8x128xf32, #tpu.memory_space<vmem>>, %arg3: memref<16x128xf32, #tpu.memory_space<vmem>>, %arg4: memref<16x128xf32, #tpu.memory_space<vmem>>, %arg5: memref<16x128xf32, #tpu.memory_space<vmem>>, %arg6: memref<16x128xf32, #tpu.memory_space<vmem>>) attributes {dimension_semantics = [#tpu.dimension_semantics<parallel>], iteration_bounds = array<i64: 1>, scalar_prefetch = 0 : i64, scratch_operands = 0 : i64, tpu.core_type = #tpu.core_type<tc>, window_params = [{transform_indices = @transform_0, window_bounds = array<i64: 16, 4>}, {pipeline_mode = #tpu.pipeline_mode<synchronous>, transform_indices = @transform_1, window_bounds = array<i64: 8, 128>}, {transform_indices = @transform_2, window_bounds = array<i64: 16, 128>}, {transform_indices = @transform_3, window_bounds = array<i64: 16, 128>}, {transform_indices = @transform_4, window_bounds = array<i64: 16, 128>}, {transform_indices = @transform_5, window_bounds = array<i64: 16, 128>}]} {
    %c0 = arith.constant 0 : index
    %c0_0 = arith.constant 0 : index
    %0 = vector.load %arg1[%c0, %c0_0] : memref<16x4xf32, #tpu.memory_space<vmem>>, vector<16x4xf32>
    %c0_1 = arith.constant 0 : index
    %c0_2 = arith.constant 0 : index
    %1 = vector.load %arg2[%c0_1, %c0_2] : memref<8x128xf32, #tpu.memory_space<vmem>>, vector<8x128xf32>
    %2 = vector.extract_strided_slice %0 {offsets = [0, 0], sizes = [16, 1], strides = [1, 1]} : vector<16x4xf32> to vector<16x1xf32>
    %3 = vector.extract_strided_slice %1 {offsets = [0, 0], sizes = [1, 128], strides = [1, 1]} : vector<8x128xf32> to vector<1x128xf32>
    %4 = vector.broadcast %2 : vector<16x1xf32> to vector<16x128xf32>
    %5 = vector.broadcast %3 : vector<1x128xf32> to vector<16x128xf32>
    %6 = arith.mulf %4, %5 : vector<16x128xf32>
    %7 = vector.extract_strided_slice %1 {offsets = [4, 0], sizes = [1, 128], strides = [1, 1]} : vector<8x128xf32> to vector<1x128xf32>
    %8 = vector.broadcast %7 : vector<1x128xf32> to vector<16x128xf32>
    %9 = arith.addf %6, %8 : vector<16x128xf32>
    %cst = arith.constant 0.000000e+00 : f32
    %10 = vector.broadcast %cst : f32 to vector<16x128xf32>
    %11 = arith.cmpf oge, %9, %10 : vector<16x128xf32>
    %cst_3 = arith.constant 0.00999999977 : f32
    %12 = vector.broadcast %cst_3 : f32 to vector<16x128xf32>
    %13 = arith.mulf %12, %9 : vector<16x128xf32>
    %14 = arith.select %11, %9, %13 : vector<16x128xi1>, vector<16x128xf32>
    %c0_4 = arith.constant 0 : index
    %c0_5 = arith.constant 0 : index
    %15 = vector.load %arg3[%c0_4, %c0_5] : memref<16x128xf32, #tpu.memory_space<vmem>>, vector<16x128xf32>
    tpu.vector_store %arg3[%c0_4, %c0_5], %14 {strides = array<i32>} : memref<16x128xf32, #tpu.memory_space<vmem>>, vector<16x128xf32>,
    %16 = vector.extract_strided_slice %0 {offsets = [0, 1], sizes = [16, 1], strides = [1, 1]} : vector<16x4xf32> to vector<16x1xf32>
    %17 = vector.extract_strided_slice %1 {offsets = [1, 0], sizes = [1, 128], strides = [1, 1]} : vector<8x128xf32> to vector<1x128xf32>
    %18 = vector.broadcast %16 : vector<16x1xf32> to vector<16x128xf32>
    %19 = vector.broadcast %17 : vector<1x128xf32> to vector<16x128xf32>
    %20 = arith.mulf %18, %19 : vector<16x128xf32>
    %21 = vector.extract_strided_slice %1 {offsets = [5, 0], sizes = [1, 128], strides = [1, 1]} : vector<8x128xf32> to vector<1x128xf32>
    %22 = vector.broadcast %21 : vector<1x128xf32> to vector<16x128xf32>
    %23 = arith.addf %20, %22 : vector<16x128xf32>
    %cst_6 = arith.constant 0.000000e+00 : f32
    %24 = vector.broadcast %cst_6 : f32 to vector<16x128xf32>
    %25 = arith.cmpf oge, %23, %24 : vector<16x128xf32>
    %cst_7 = arith.constant 0.00999999977 : f32
    %26 = vector.broadcast %cst_7 : f32 to vector<16x128xf32>
    %27 = arith.mulf %26, %23 : vector<16x128xf32>
    %28 = arith.select %25, %23, %27 : vector<16x128xi1>, vector<16x128xf32>
    %c0_8 = arith.constant 0 : index
    %c0_9 = arith.constant 0 : index
    %29 = vector.load %arg4[%c0_8, %c0_9] : memref<16x128xf32, #tpu.memory_space<vmem>>, vector<16x128xf32>
    tpu.vector_store %arg4[%c0_8, %c0_9], %28 {strides = array<i32>} : memref<16x128xf32, #tpu.memory_space<vmem>>, vector<16x128xf32>,
    %30 = vector.extract_strided_slice %0 {offsets = [0, 2], sizes = [16, 1], strides = [1, 1]} : vector<16x4xf32> to vector<16x1xf32>
    %31 = vector.extract_strided_slice %1 {offsets = [2, 0], sizes = [1, 128], strides = [1, 1]} : vector<8x128xf32> to vector<1x128xf32>
    %32 = vector.broadcast %30 : vector<16x1xf32> to vector<16x128xf32>
    %33 = vector.broadcast %31 : vector<1x128xf32> to vector<16x128xf32>
    %34 = arith.mulf %32, %33 : vector<16x128xf32>
    %35 = vector.extract_strided_slice %1 {offsets = [6, 0], sizes = [1, 128], strides = [1, 1]} : vector<8x128xf32> to vector<1x128xf32>
    %36 = vector.broadcast %35 : vector<1x128xf32> to vector<16x128xf32>
    %37 = arith.addf %34, %36 : vector<16x128xf32>
    %cst_10 = arith.constant 0.000000e+00 : f32
    %38 = vector.broadcast %cst_10 : f32 to vector<16x128xf32>
    %39 = arith.cmpf oge, %37, %38 : vector<16x128xf32>
    %cst_11 = arith.constant 0.00999999977 : f32
    %40 = vector.broadcast %cst_11 : f32 to vector<16x128xf32>
    %41 = arith.mulf %40, %37 : vector<16x128xf32>
    %42 = arith.select %39, %37, %41 : vector<16x128xi1>, vector<16x128xf32>
    %c0_12 = arith.constant 0 : index
    %c0_13 = arith.constant 0 : index
    %43 = vector.load %arg5[%c0_12, %c0_13] : memref<16x128xf32, #tpu.memory_space<vmem>>, vector<16x128xf32>
    tpu.vector_store %arg5[%c0_12, %c0_13], %42 {strides = array<i32>} : memref<16x128xf32, #tpu.memory_space<vmem>>, vector<16x128xf32>,
    %44 = vector.extract_strided_slice %0 {offsets = [0, 3], sizes = [16, 1], strides = [1, 1]} : vector<16x4xf32> to vector<16x1xf32>
    %45 = vector.extract_strided_slice %1 {offsets = [3, 0], sizes = [1, 128], strides = [1, 1]} : vector<8x128xf32> to vector<1x128xf32>
    %46 = vector.broadcast %44 : vector<16x1xf32> to vector<16x128xf32>
    %47 = vector.broadcast %45 : vector<1x128xf32> to vector<16x128xf32>
    %48 = arith.mulf %46, %47 : vector<16x128xf32>
    %49 = vector.extract_strided_slice %1 {offsets = [7, 0], sizes = [1, 128], strides = [1, 1]} : vector<8x128xf32> to vector<1x128xf32>
    %50 = vector.broadcast %49 : vector<1x128xf32> to vector<16x128xf32>
    %51 = arith.addf %48, %50 : vector<16x128xf32>
    %cst_14 = arith.constant 0.000000e+00 : f32
    %52 = vector.broadcast %cst_14 : f32 to vector<16x128xf32>
    %53 = arith.cmpf oge, %51, %52 : vector<16x128xf32>
    %cst_15 = arith.constant 0.00999999977 : f32
    %54 = vector.broadcast %cst_15 : f32 to vector<16x128xf32>
    %55 = arith.mulf %54, %51 : vector<16x128xf32>
    %56 = arith.select %53, %51, %55 : vector<16x128xi1>, vector<16x128xf32>
    %c0_16 = arith.constant 0 : index
    %c0_17 = arith.constant 0 : index
    %57 = vector.load %arg6[%c0_16, %c0_17] : memref<16x128xf32, #tpu.memory_space<vmem>>, vector<16x128xf32>
    tpu.vector_store %arg6[%c0_16, %c0_17], %56 {strides = array<i32>} : memref<16x128xf32, #tpu.memory_space<vmem>>, vector<16x128xf32>,
    return
  }
  func.func @transform_0(%arg0: i32) -> (i32, i32) {
    %c0_i32 = arith.constant 0 : i32
    %c0_i32_0 = arith.constant 0 : i32
    return %arg0, %c0_i32 : i32, i32
  }
  func.func @transform_1(%arg0: i32) -> (i32, i32) {
    %c0_i32 = arith.constant 0 : i32
    %c0_i32_0 = arith.constant 0 : i32
    %c0_i32_1 = arith.constant 0 : i32
    return %c0_i32, %c0_i32_0 : i32, i32
  }
  func.func @transform_2(%arg0: i32) -> (i32, i32) {
    %c0_i32 = arith.constant 0 : i32
    %c0_i32_0 = arith.constant 0 : i32
    return %arg0, %c0_i32 : i32, i32
  }
  func.func @transform_3(%arg0: i32) -> (i32, i32) {
    %c0_i32 = arith.constant 0 : i32
    %c0_i32_0 = arith.constant 0 : i32
    return %arg0, %c0_i32 : i32, i32
  }
  func.func @transform_4(%arg0: i32) -> (i32, i32) {
    %c0_i32 = arith.constant 0 : i32
    %c0_i32_0 = arith.constant 0 : i32
    return %arg0, %c0_i32 : i32, i32
  }
  func.func @transform_5(%arg0: i32) -> (i32, i32) {
    %c0_i32 = arith.constant 0 : i32
    %c0_i32_0 = arith.constant 0 : i32
    return %arg0, %c0_i32 : i32, i32
  }
}

</mosaic_0001>

<bundles_post_ra>
// kernel: tpu_custom_call.1
= control target key start
LH: loop header
LB: loop body
LE: loop exit
PB: predicated region body
PF: predicated region fallthrough
CT: control target
= control target key end

     0   :  { %11 = vsyncpa [#allocation3], 0  ;;  %s440_s0 = inlined_call_operand.vmem [shape: f32[16,4], index: 0, kind: input, shape index: {}]   ;;  %s441_s1 = inlined_call_operand.vmem [shape: f32[8,128], index: 1, kind: input, shape index: {}]   ;;  %s442_s2 = inlined_call_operand.hbm [shape: f32[16,128], index: 2, kind: output, shape index: {0}]   ;;  %s443_s3 = inlined_call_operand.hbm [shape: f32[16,128], index: 3, kind: output, shape index: {1}]   ;;  %s444_s4 = inlined_call_operand.hbm [shape: f32[16,128], index: 4, kind: output, shape index: {2}]   ;;  %s445_s5 = inlined_call_operand.hbm [shape: f32[16,128], index: 5, kind: output, shape index: {3}]  }
   0x1   :  { %12 = vsyncpa [#allocation5], 0  ;;  %v18_v0 = vld [vmem:[%s440_s0] sm:$0xff]  ;;  %v308_v1 = vmov 1   ;;  %v309_v2 = vmov 0  }
   0x2   :  { %208 = vset.pattern.permute.xlu0 %v308_v1  ;;  %209 = vset.pattern.permute.xlu1 %v309_v2 }
   0x3   :  { %13 = vsyncpa [#allocation8], 0  ;;  %23 = vperm.xlu1 %209, %v18_v0   ;;  %52 = vperm.xlu0 %208, %v18_v0   ;;  %v19_v3 = vld [vmem:[%s440_s0 + $0x8] sm:$0xff]  ;;  %v310_v4 = vmov 2   ;;  %v311_v5 = vmov 3   ;;  %v31_v6 = vlaneseq  ;;  %v20_v10 = vld [vmem:[%s441_s1] sm:$0xff] }
   0x4   :  { %s312_s0 = smov [#allocation4]   ;;  %s313_s24 = smov [#allocation2]  }
   0x5   :  { %v32_v7 = vshrl.u32 %v31_v6, 7  ;;  %s152_s1 = sshll.u32 %s312_s0, 4  ;;  %s140_s25 = sshll.u32 %s313_s24, 4  ;;  %s357_s1 = int_to_ptr.vmem [resolvable:$true] %s152_s1  ;;  %s359_s25 = int_to_ptr.vmem [resolvable:$true] %s140_s25 }
   0x6   :  { %s314_s26 = smov [#allocation6]   ;;  %s214_s28 = scalar_lea.vmem %s357_s1, 256 }
   0x7   :  { %28 = vperm.xlu1 %209, %v19_v3   ;;  %56 = vperm.xlu0 %208, %v19_v3   ;;  %v33_v8 = vsub.s32 0, %v32_v7  ;;  %v61_v9 = vsub.s32 1, %v32_v7  ;;  %v39_v11 = vsub.s32 4, %v32_v7  ;;  %v67_v12 = vsub.s32 5, %v32_v7  ;;  %s164_s27 = sshll.u32 %s314_s26, 4  ;;  %p215_p0 = scmp.ne.s32.totalorder %s357_s1, %s214_s28  ;;  %s381_s27 = int_to_ptr.vmem [resolvable:$true] %s164_s27 }
   0x8   :  { %v89_v23 = vsub.s32 2, %v32_v7  ;;  %v95_v26 = vsub.s32 6, %v32_v7  ;;  %v117_v36 = vsub.s32 3, %v32_v7  ;;  %v123_v40 = vsub.s32 7, %v32_v7  ;;  %p219_p1 = scmp.lt.s32.totalorder %s357_s1, %s357_s1  ;;  %p220_p2 = scmp.lt.s32.totalorder %s214_s28, %s214_s28 }
   0x9   :  { %v34_v13 = vrot.slane %v20_v10, %v33_v8  ;;  %v62_v14 = vrot.slane %v20_v10, %v61_v9  ;;  %v40_v15 = vrot.slane %v20_v10, %v39_v11  ;;  %v68_v16 = vrot.slane %v20_v10, %v67_v12 }
   0xa   :  { %v90_v31 = vrot.slane %v20_v10, %v89_v23  ;;  %v96_v37 = vrot.slane %v20_v10, %v95_v26  ;;  %v118_v45 = vrot.slane %v20_v10, %v117_v36  ;;  %v124_v50 = vrot.slane %v20_v10, %v123_v40  ;;  %p221_p3 = por %p220_p2, %p219_p1 }
   0xb   :  { %211 = vset.pattern.permute.xlu1 %v310_v4  ;;  %210 = vset.pattern.permute.xlu0 %v310_v4 }
   0xc   :  { %84 = vperm.xlu1 %211, %v19_v3   ;;  %80 = vperm.xlu0 %210, %v18_v0   ;;  %p222_p4 = pnand %p221_p3, %p215_p0 }
  0x10   :  { %212 = vset.pattern.permute.xlu1 %v311_v5  ;;  %213 = vset.pattern.permute.xlu0 %v311_v5 }
  0x11   :  { %108 = vperm.xlu1 %212, %v18_v0   ;;  %112 = vperm.xlu0 %213, %v19_v3  }
  0x82   :  { %v24_v17 = vpop.permute.xlu1 %23  ;;  %v53_v18 = vpop.permute.xlu0 %52 }
  0x83   :  { %v35_v19 = vmul.f32 %v34_v13, %v24_v17  ;;  %v63_v20 = vmul.f32 %v62_v14, %v53_v18 }
  0x85   :  { %v41_v21 = vadd.f32 %v40_v15, %v35_v19  ;;  %v69_v22 = vadd.f32 %v68_v16, %v63_v20 }
  0x86   :  { %v29_v24 = vpop.permute.xlu1 %28  ;;  %v57_v25 = vpop.permute.xlu0 %56 }
  0x87   :  { %vm43_vm0 = vcmp.ge.f32.partialorder %v41_v21, 0.0  ;;  %v45_v27 = vmul.f32 0.01, %v41_v21  ;;  %vm71_vm1 = vcmp.ge.f32.partialorder %v69_v22, 0.0  ;;  %v73_v28 = vmul.f32 0.01, %v69_v22 }
  0x88   :  { %v36_v29 = vmul.f32 %v34_v13, %v29_v24  ;;  %v64_v30 = vmul.f32 %v62_v14, %v57_v25 }
  0x89   :  { %v75_v32 = vsel %vm71_vm1, %v69_v22, %v73_v28  ;;  %v47_v33 = vsel %vm43_vm0, %v41_v21, %v45_v27 }
  0x8a   :  { %v42_v34 = vadd.f32 %v40_v15, %v36_v29  ;;  %v70_v35 = vadd.f32 %v68_v16, %v64_v30  ;;  %77 = vst [vmem:[#allocation4] sm:$0xff] %v75_v32  ;;  %49 = vst [vmem:[#allocation2] sm:$0xff] %v47_v33 }
  0x8b   :  { %v85_v38 = vpop.permute.xlu1 %84  ;;  %v81_v39 = vpop.permute.xlu0 %80 }
  0x8c   :  { %vm44_vm2 = vcmp.ge.f32.partialorder %v42_v34, 0.0  ;;  %v46_v41 = vmul.f32 0.01, %v42_v34  ;;  %vm72_vm3 = vcmp.ge.f32.partialorder %v70_v35, 0.0  ;;  %v74_v42 = vmul.f32 0.01, %v70_v35 }
  0x8d   :  { %v92_v43 = vmul.f32 %v90_v31, %v85_v38  ;;  %v91_v44 = vmul.f32 %v90_v31, %v81_v39 }
  0x8e   :  { %v76_v46 = vsel %vm72_vm3, %v70_v35, %v74_v42  ;;  %v48_v47 = vsel %vm44_vm2, %v42_v34, %v46_v41 }
  0x8f   :  { %v98_v48 = vadd.f32 %v96_v37, %v92_v43  ;;  %v97_v49 = vadd.f32 %v96_v37, %v91_v44  ;;  %78 = vst [vmem:[#allocation4 + $0x8] sm:$0xff] %v76_v46  ;;  %50 = vst [vmem:[#allocation2 + $0x8] sm:$0xff] %v48_v47 }
  0x90   :  { %v109_v51 = vpop.permute.xlu1 %108  ;;  %v113_v52 = vpop.permute.xlu0 %112 }
  0x91   :  { %225 = shalt.err (!%p222_p4)
}
  0x92   :  { %s226_s6 = scalar_lea.hbm %s443_s3, 256 }
  0x93   :  { %p227_p5 = scmp.ne.s32.totalorder %s443_s3, %s226_s6  ;;  %p230_p6 = scmp.lt.u32.totalorder %s226_s6, %s443_s3 }
  0x95   :  { %p232_p7 = pnand %p230_p6, %p227_p5 }
  0x97   :  { %235 = shalt.err (!%p232_p7)
}
  0x98   :  { %s315_s11 = smov 128   ;;  %s316_s12 = smov 8   ;;  %vm100_vm4 = vcmp.ge.f32.partialorder %v98_v48, 0.0  ;;  %v102_v53 = vmul.f32 0.01, %v98_v48  ;;  %vm99_vm5 = vcmp.ge.f32.partialorder %v97_v49, 0.0  ;;  %v119_v55 = vmul.f32 %v118_v45, %v109_v51 }
  0x99   :  { %158 = dma.vmem_to_hbm [thread:$0]  %s357_s1, 256, %s443_s3, [#allocation5], %s315_s11, %s315_s11, %s316_s12   ;;  %v101_v54 = vmul.f32 0.01, %v97_v49  ;;  %v120_v56 = vmul.f32 %v118_v45, %v113_v52 }
  0x9a   :  { %s236_s15 = scalar_lea.vmem %s359_s25, 256  ;;  %p241_p9 = scmp.lt.s32.totalorder %s359_s25, %s359_s25 }
  0x9b   :  { %p237_p8 = scmp.ne.s32.totalorder %s359_s25, %s236_s15  ;;  %p242_p10 = scmp.lt.s32.totalorder %s236_s15, %s236_s15 }
  0x9d   :  { %p243_p11 = por %p242_p10, %p241_p9 }
  0x9f   :  { %p244_p12 = pnand %p243_p11, %p237_p8 }
  0xa1   :  { %247 = shalt.err (!%p244_p12)
}
  0xa2   :  { %s248_s3 = scalar_lea.hbm %s442_s2, 256 }
  0xa3   :  { %p249_p13 = scmp.ne.s32.totalorder %s442_s2, %s248_s3  ;;  %p252_p0 = scmp.lt.u32.totalorder %s248_s3, %s442_s2 }
  0xa5   :  { %p254_p1 = pnand %p252_p0, %p249_p13 }
  0xa7   :  { %257 = shalt.err (!%p254_p1)
}
  0xa8   :  { %146 = dma.vmem_to_hbm [thread:$0]  %s359_s25, 256, %s442_s2, [#allocation3], %s315_s11, %s315_s11, %s316_s12   ;;  %v104_v57 = vsel %vm100_vm4, %v98_v48, %v102_v53  ;;  %v103_v58 = vsel %vm99_vm5, %v97_v49, %v101_v54  ;;  %v125_v59 = vadd.f32 %v124_v50, %v119_v55  ;;  %v126_v60 = vadd.f32 %v124_v50, %v120_v56 }
  0xa9   :  { %106 = vst [vmem:[#allocation6 + $0x8] sm:$0xff] %v104_v57  ;;  %105 = vst [vmem:[#allocation6] sm:$0xff] %v103_v58  ;;  %s317_s0 = smov [#allocation7]   ;;  %s258_s24 = scalar_lea.vmem %s381_s27, 256 }
  0xaa   :  { %s176_s1 = sshll.u32 %s317_s0, 4  ;;  %p259_p2 = scmp.ne.s32.totalorder %s381_s27, %s258_s24  ;;  %s177_s1 = int_to_ptr.vmem [resolvable:$true] %s176_s1 }
  0xab   :  { %p263_p3 = scmp.lt.s32.totalorder %s381_s27, %s381_s27  ;;  %p264_p4 = scmp.lt.s32.totalorder %s258_s24, %s258_s24 }
  0xad   :  { %p265_p5 = por %p264_p4, %p263_p3 }
  0xaf   :  { %p266_p6 = pnand %p265_p5, %p259_p2 }
  0xb1   :  { %269 = shalt.err (!%p266_p6)
}
  0xb2   :  { %s270_s25 = scalar_lea.hbm %s444_s4, 256 }
  0xb3   :  { %p271_p7 = scmp.ne.s32.totalorder %s444_s4, %s270_s25  ;;  %p274_p8 = scmp.lt.u32.totalorder %s270_s25, %s444_s4 }
  0xb5   :  { %p276_p9 = pnand %p274_p8, %p271_p7 }
  0xb7   :  { %279 = shalt.err (!%p276_p9)
}
  0xb8   :  { %170 = dma.vmem_to_hbm [thread:$0]  %s381_s27, 256, %s444_s4, [#allocation5], %s315_s11, %s315_s11, %s316_s12   ;;  %vm127_vm6 = vcmp.ge.f32.partialorder %v125_v59, 0.0  ;;  %v129_v61 = vmul.f32 0.01, %v125_v59  ;;  %vm128_vm7 = vcmp.ge.f32.partialorder %v126_v60, 0.0 }
  0xb9   :  { %v130_v62 = vmul.f32 0.01, %v126_v60  ;;  %s280_s9 = scalar_lea.vmem %s177_s1, 256  ;;  %p285_p11 = scmp.lt.s32.totalorder %s177_s1, %s177_s1 }
  0xba   :  { %v131_v63 = vsel %vm127_vm6, %v125_v59, %v129_v61  ;;  %p281_p10 = scmp.ne.s32.totalorder %s177_s1, %s280_s9  ;;  %p286_p12 = scmp.lt.s32.totalorder %s280_s9, %s280_s9 }
  0xbb   :  { %v132_v0 = vsel %vm128_vm7, %v126_v60, %v130_v62  ;;  %133 = vst [vmem:[#allocation7] sm:$0xff] %v131_v63 }
  0xbc   :  { %134 = vst [vmem:[#allocation7 + $0x8] sm:$0xff] %v132_v0  ;;  %p287_p13 = por %p286_p12, %p285_p11 }
  0xbe   :  { %p288_p0 = pnand %p287_p13, %p281_p10 }
  0xc0   :  { %291 = shalt.err (!%p288_p0)
}
  0xc1   :  { %s292_s4 = scalar_lea.hbm %s445_s5, 256 }
  0xc2   :  { %p293_p1 = scmp.ne.s32.totalorder %s445_s5, %s292_s4  ;;  %p296_p2 = scmp.lt.u32.totalorder %s292_s4, %s445_s5 }
  0xc4   :  { %p298_p3 = pnand %p296_p2, %p293_p1 }
  0xc6   :  { %301 = shalt.err (!%p298_p3)
}
  0xc7   :  { %182 = dma.vmem_to_hbm [thread:$0]  %s177_s1, 256, %s445_s5, [#allocation8], %s315_s11, %s315_s11, %s316_s12  }
  0xc8   :  { %302 = dma.done.wait [#allocation3], 256  }
  0xc9   :  { %303 = vsyncadd [#allocation3], 4294967040 }
  0xca   :  { %304 = dma.done.wait [#allocation5], 512  }
  0xcb   :  { %305 = vsyncadd [#allocation5], 4294966784 }
  0xcc   :  { %306 = dma.done.wait [#allocation8], 256  }
  0xcd   :  { %307 = vsyncadd [#allocation8], 4294967040 }
  0xce   :  { %195 = vsyncpa [#allocation3], 1 }
  0xcf   :  { %196 = vsyncpa [#allocation5], 1 }
  0xd0   :  { %197 = vsyncpa [#allocation8], 1 }

</bundles_post_ra>
